<compile_context>
chip_gen: v7x
topology: tpu7x:2x2x1
jax: 0.10.0
libtpu: 0.0.40
codegen_flags: <defaults>
</compile_context>

<pallas_src>
import functools
import numpy as np

import jax
import jax.numpy as jnp
from jax.experimental import pallas as pl
from jax.experimental.pallas import tpu as pltpu

NEG_SLOPE = 0.01     # nn.LeakyReLU() default
BN_EPS = 1e-5        # nn.BatchNorm2d default

ANCHORS = [[10, 13], [16, 30], [33, 23], [30, 61], [62, 45],
           [59, 119], [116, 90], [156, 198], [373, 326]]


def _round_up(x, m):
    return ((x + m - 1) // m) * m


def _chip_config():
    """Per-generation tile width and VMEM limit."""
    kind = ""
    try:
        kind = jax.devices()[0].device_kind.lower()
    except Exception:
        pass
    # v6e / v7x MXUs are 256 wide; v5e (and unknown) stays at 128.
    tn = 256 if ("v6" in kind or "v7" in kind) else 128
    # 48 MiB leaves headroom below v7x's 64 MiB physical VMEM and below the
    # 128 MiB of v5e/v6e.  Refine from the hardware query when available.
    vmem_limit = 48 * 1024 * 1024
    try:
        cap = int(pltpu.get_tpu_info().vmem_capacity_bytes)
        vmem_limit = min(vmem_limit, (cap * 3) // 4)
    except Exception:
        pass
    return tn, vmem_limit


_TN_MAX, _VMEM_LIMIT = _chip_config()
_TM_MAX = 512


# ----------------------------------------------------------------------------
# Pallas kernels
# ----------------------------------------------------------------------------
def _conv_pass1_kernel(*refs, do_res, do_stats, act):
    """bf16 MXU matmul (+residual, +LeakyReLU) in f32; accumulate BN stats."""
    it = iter(refs)
    a_ref = next(it)                       # (TM, K) bf16 im2col patches
    b_ref = next(it)                       # (K, TN) bf16 weights
    r_ref = next(it) if do_res else None   # (TM, TN) f32 residual
    z_ref = next(it)                       # (TM, TN) f32 pre-BN output
    sum_ref = next(it) if do_stats else None   # (1, TN) f32 per-channel sum
    ssq_ref = next(it) if do_stats else None   # (1, TN) f32 per-channel ssq

    z = jnp.dot(a_ref[...], b_ref[...], preferred_element_type=jnp.float32)
    if do_res:
        z = z + r_ref[...]
    if act:                                 # residual tail: act BEFORE BN
        z = jnp.where(z >= 0, z, NEG_SLOPE * z)
    z_ref[...] = z

    if do_stats:
        # Zero-padded rows contribute 0 to both sums, so no masking is needed;
        # mean/var are finalized with the true row count in pass 2.
        @pl.when(pl.program_id(1) == 0)
        def _():
            sum_ref[...] = jnp.zeros_like(sum_ref)
            ssq_ref[...] = jnp.zeros_like(ssq_ref)
        sum_ref[...] = sum_ref[...] + jnp.sum(z, axis=0, keepdims=True)
        ssq_ref[...] = ssq_ref[...] + jnp.sum(z * z, axis=0, keepdims=True)


def _bn_apply_kernel(z_ref, sum_ref, ssq_ref, g_ref, bt_ref, o_ref,
                     *, true_m, act_after):
    """Training-mode BN normalize (+ optional LeakyReLU), all in f32."""
    inv_m = jnp.float32(1.0 / true_m)
    z = z_ref[...]
    mean = sum_ref[...] * inv_m
    var = jnp.maximum(ssq_ref[...] * inv_m - mean * mean, 0.0)   # biased var
    scale = jax.lax.rsqrt(var + BN_EPS) * g_ref[...]
    y = (z - mean) * scale + bt_ref[...]
    if act_after:
        y = jnp.where(y >= 0, y, NEG_SLOPE * y)
    o_ref[...] = y


def _masked_ssq_kernel(x_ref, m_ref, o_ref):
    x = x_ref[...]
    w = m_ref[...]
    s = jnp.sum(x * x * w, axis=1, keepdims=True)
    o_ref[...] = jnp.broadcast_to(s, o_ref.shape)


# ----------------------------------------------------------------------------
# Pallas call wrappers
# ----------------------------------------------------------------------------
@functools.partial(jax.jit,
                   static_argnames=("do_res", "do_stats", "act", "tm", "tn"))
def _conv_pass1_call(a, b, r, *, do_res, do_stats, act, tm, tn):
    mp, kp = a.shape
    n_pad = b.shape[1]
    grid = (n_pad // tn, mp // tm)          # (channel tiles, row tiles)
    kernel = functools.partial(_conv_pass1_kernel,
                               do_res=do_res, do_stats=do_stats, act=act)
    in_specs = [pl.BlockSpec((tm, kp), lambda j, i: (i, 0)),
                pl.BlockSpec((kp, tn), lambda j, i: (0, j))]
    operands = [a, b]
    if do_res:
        in_specs.append(pl.BlockSpec((tm, tn), lambda j, i: (i, j)))
        operands.append(r)

    if do_stats:
        out_shape = (jax.ShapeDtypeStruct((mp, n_pad), jnp.float32),
                     jax.ShapeDtypeStruct((1, n_pad), jnp.float32),
                     jax.ShapeDtypeStruct((1, n_pad), jnp.float32))
        out_specs = [pl.BlockSpec((tm, tn), lambda j, i: (i, j)),
                     pl.BlockSpec((1, tn), lambda j, i: (0, j)),
                     pl.BlockSpec((1, tn), lambda j, i: (0, j))]
        sem = ("parallel", "arbitrary")     # M axis accumulates BN stats
    else:
        out_shape = jax.ShapeDtypeStruct((mp, n_pad), jnp.float32)
        out_specs = pl.BlockSpec((tm, tn), lambda j, i: (i, j))
        sem = ("parallel", "parallel")

    out = pl.pallas_call(
        kernel,
        out_shape=out_shape,
        grid=grid,
        in_specs=in_specs,
        out_specs=out_specs,
        compiler_params=pltpu.CompilerParams(
            dimension_semantics=sem,
            vmem_limit_bytes=_VMEM_LIMIT),
    )(*operands)
    if do_stats:
        return out                          # (z, sum, ssq)
    return out, None, None


@functools.partial(jax.jit,
                   static_argnames=("act_after", "true_m", "tm", "tn"))
def _bn_apply_call(z, s, q, g, bt, *, act_after, true_m, tm, tn):
    mp, n_pad = z.shape
    grid = (n_pad // tn, mp // tm)
    kernel = functools.partial(_bn_apply_kernel,
                               true_m=true_m, act_after=act_after)
    vec = pl.BlockSpec((1, tn), lambda j, i: (0, j))
    return pl.pallas_call(
        kernel,
        out_shape=jax.ShapeDtypeStruct((mp, n_pad), jnp.float32),
        grid=grid,
        in_specs=[pl.BlockSpec((tm, tn), lambda j, i: (i, j)),
                  vec, vec, vec, vec],
        out_specs=pl.BlockSpec((tm, tn), lambda j, i: (i, j)),
        compiler_params=pltpu.CompilerParams(
            dimension_semantics=("parallel", "parallel"),
            vmem_limit_bytes=_VMEM_LIMIT),
    )(z, s, q, g, bt)


@jax.jit
def _masked_ssq(x, m):
    """Per-row sum(x^2 * mask); one batched call per YOLO head."""
    bsz, length = x.shape
    lp = _round_up(length, 128)
    if lp != length:
        x = jnp.pad(x, ((0, 0), (0, lp - length)))
        m = jnp.pad(m, ((0, 0), (0, lp - length)))
    out = pl.pallas_call(
        _masked_ssq_kernel,
        out_shape=jax.ShapeDtypeStruct((bsz, 128), jnp.float32),
        grid=(1,),
        in_specs=[pl.BlockSpec((bsz, lp), lambda i: (0, 0)),
                  pl.BlockSpec((bsz, lp), lambda i: (0, 0))],
        out_specs=pl.BlockSpec((bsz, 128), lambda i: (0, 0)),
        compiler_params=pltpu.CompilerParams(
            vmem_limit_bytes=_VMEM_LIMIT),
    )(x, m)
    return out[:, 0]


# ----------------------------------------------------------------------------
# Conv wrappers (glue: im2col / padding / reshape)
# ----------------------------------------------------------------------------
def _im2col(x, k, stride, pad):
    # TODO(synk): im2col for 3x3 convs still materializes ~9x activation bytes
    # in HBM (bf16 halves it); fusing the 9 shifted matmuls into the kernel is
    # the remaining HBM-bandwidth win.
    n, h, w, c = x.shape
    xp = jnp.pad(x, ((0, 0), (pad, pad), (pad, pad), (0, 0))) if pad > 0 else x
    ho = (h + 2 * pad - k) // stride + 1
    wo = (w + 2 * pad - k) // stride + 1
    cols = []
    for di in range(k):
        for dj in range(k):
            cols.append(xp[:, di:di + stride * ho:stride,
                           dj:dj + stride * wo:stride, :])
    patches = jnp.concatenate(cols, axis=-1) if len(cols) > 1 else cols[0]
    return patches.reshape(n * ho * wo, k * k * c), (n, ho, wo)


def _run_conv(x, w, gamma, beta, stride, pad, *,
              do_bn, act_first=False, residual=None):
    cout, cin, kh, kw = w.shape
    a, (n, ho, wo) = _im2col(x.astype(jnp.bfloat16), kh, stride, pad)
    m, k = a.shape
    wm = jnp.transpose(w, (2, 3, 1, 0)).reshape(kh * kw * cin, cout)
    wm = wm.astype(jnp.bfloat16)

    tn = min(_TN_MAX, _round_up(cout, 128))
    n_pad = _round_up(cout, tn)
    k_pad = _round_up(k, 128)
    if m <= _TM_MAX:
        m_pad = _round_up(m, 16)            # bf16 sublane packing = 16 rows
        tm = m_pad
    else:
        tm = _TM_MAX
        m_pad = _round_up(m, tm)

    if k_pad != k:
        a = jnp.pad(a, ((0, 0), (0, k_pad - k)))
        wm = jnp.pad(wm, ((0, k_pad - k), (0, 0)))
    if n_pad != cout:
        wm = jnp.pad(wm, ((0, 0), (0, n_pad - cout)))
    if m_pad != m:
        a = jnp.pad(a, ((0, m_pad - m), (0, 0)))

    r = None
    if residual is not None:
        r = residual.reshape(m, cout).astype(jnp.float32)
        if m_pad != m or n_pad != cout:
            r = jnp.pad(r, ((0, m_pad - m), (0, n_pad - cout)))

    z, s, q = _conv_pass1_call(a, wm, r, do_res=residual is not None,
                               do_stats=do_bn, act=act_first, tm=tm, tn=tn)
    if do_bn:
        g2 = jnp.pad(gamma.astype(jnp.float32),
                     (0, n_pad - cout)).reshape(1, n_pad)
        b2 = jnp.pad(beta.astype(jnp.float32),
                     (0, n_pad - cout)).reshape(1, n_pad)
        out = _bn_apply_call(z, s, q, g2, b2, act_after=not act_first,
                             true_m=m, tm=tm, tn=tn)
    else:
        out = z
    return out[:m, :cout].reshape(n, ho, wo, cout)


def conv_bn_lrelu(x, p, stride=1):
    k = p["w"].shape[-1]
    return _run_conv(x, p["w"], p["gamma"], p["beta"], stride, (k - 1) // 2,
                     do_bn=True, act_first=False)


def plain_conv(x, w, stride=1):
    k = w.shape[-1]
    return _run_conv(x, w, None, None, stride, (k - 1) // 2, do_bn=False)


def residual_block(x, p):
    # y = LeakyReLU(BN_mid(conv1x1(x))); z = BN_out(LeakyReLU(x + conv3x3(y)))
    y = conv_bn_lrelu(x, p["conv1"], stride=1)
    return _run_conv(y, p["w2"], p["gamma_out"], p["beta_out"], 1, 1,
                     do_bn=True, act_first=True, residual=x)


def upsample2(x):          # nn.Upsample(scale_factor=2), default 'nearest'
    return jnp.repeat(jnp.repeat(x, 2, axis=1), 2, axis=2)


# ----------------------------------------------------------------------------
# Parameter init (deterministic, synthetic)
# ----------------------------------------------------------------------------
def _init_conv(key, cin, cout, k):
    return jax.random.normal(key, (cout, cin, k, k), jnp.float32) / np.sqrt(cin * k * k)


def _init_cbl(key, cin, cout, k):
    k1, k2, k3 = jax.random.split(key, 3)
    return {"w": _init_conv(k1, cin, cout, k),
            "gamma": 1.0 + 0.1 * jax.random.normal(k2, (cout,), jnp.float32),
            "beta": 0.1 * jax.random.normal(k3, (cout,), jnp.float32)}


def _init_residual(key, cin, mid, cout):
    k1, k2, k3, k4 = jax.random.split(key, 4)
    return {"conv1": _init_cbl(k1, cin, mid, 1),
            "w2": _init_conv(k2, mid, cout, 3),
            "gamma_out": 1.0 + 0.1 * jax.random.normal(k3, (cout,), jnp.float32),
            "beta_out": 0.1 * jax.random.normal(k4, (cout,), jnp.float32)}


def init_params(key, C):
    nc = 3 * (5 + C)
    keys = iter(jax.random.split(key, 64))
    nk = lambda: next(keys)
    p = {}
    p["conv1_0"] = _init_cbl(nk(), 3, 32, 3)
    p["conv1_1"] = _init_cbl(nk(), 32, 64, 3)
    p["res1"] = [_init_residual(nk(), 64, 32, 64)]
    p["conv2"] = _init_cbl(nk(), 64, 128, 3)
    p["res2"] = [_init_residual(nk(), 128, 64, 128) for _ in range(2)]
    p["conv3"] = _init_cbl(nk(), 128, 256, 3)
    p["res3"] = [_init_residual(nk(), 256, 128, 256) for _ in range(8)]
    p["conv4"] = _init_cbl(nk(), 256, 512, 3)
    p["res4"] = [_init_residual(nk(), 512, 256, 512) for _ in range(8)]
    p["conv5"] = _init_cbl(nk(), 512, 1024, 3)
    p["res5"] = [_init_residual(nk(), 1024, 512, 1024) for _ in range(4)]
    p["y1c1"] = [_init_cbl(nk(), 1024, 512, 1), _init_cbl(nk(), 512, 1024, 3),
                 _init_cbl(nk(), 1024, 512, 1), _init_cbl(nk(), 512, 1024, 3),
                 _init_cbl(nk(), 1024, 512, 1)]
    p["y1c2_0"] = _init_cbl(nk(), 512, 1024, 3)
    p["y1c2_1"] = _init_conv(nk(), 1024, nc, 1)
    p["y2c1"] = _init_cbl(nk(), 512, 256, 1)
    p["merge2"] = _init_cbl(nk(), 512, 256, 1)
    p["y2c2"] = [_init_cbl(nk(), 512, 256, 1), _init_cbl(nk(), 256, 512, 3),
                 _init_cbl(nk(), 512, 256, 1), _init_cbl(nk(), 256, 512, 3),
                 _init_cbl(nk(), 512, 256, 1)]
    p["y2c3_0"] = _init_cbl(nk(), 256, 512, 3)
    p["y2c3_1"] = _init_conv(nk(), 512, nc, 1)
    p["y3c1"] = _init_cbl(nk(), 256, 128, 1)
    p["merge3"] = _init_cbl(nk(), 256, 128, 1)
    p["y3c2"] = [_init_cbl(nk(), 256, 128, 1), _init_cbl(nk(), 128, 256, 3),
                 _init_cbl(nk(), 256, 128, 1), _init_cbl(nk(), 128, 256, 3),
                 _init_cbl(nk(), 256, 128, 1)]
    p["y3c3_0"] = _init_cbl(nk(), 128, 256, 3)
    p["y3c3_1"] = _init_conv(nk(), 256, nc, 1)
    return p


# ----------------------------------------------------------------------------
# YOLO loss (same semantics as the reference `Yolo.forward`)
# ----------------------------------------------------------------------------
def _sigmoid(v):
    return 1.0 / (1.0 + np.exp(-v))


def _iou(b1, b2):
    A = (b1[2] - b1[0] + 1) * (b1[3] - b1[1] + 1)
    B = (b2[2] - b2[0] + 1) * (b2[3] - b2[1] + 1)
    CM = (min(b1[2], b2[2]) - max(b1[0], b2[0]) + 1) * \
         (min(b1[3], b2[3]) - max(b1[1], b2[1]) + 1)
    return CM / (A + B - CM)


def _iou_index(w, h):
    best, idx = 0, 0
    for i, a in enumerate(ANCHORS):
        v = _iou([0, 0, a[0], a[1]], [0, 0, w, h])
        if best < v:
            best, idx = v, i
    return idx


def yolo_loss(y_nchw, boxes, s_index, e_index, S, C, img_size,
              lambda_coord, lambda_noobj):
    # TODO(synk): the per-box branch is data-dependent host control flow
    # (.item()-style scalars in the reference); the whole head is transferred
    # to the host ONCE and the scalar IoU/box math runs in NumPy, while the
    # heavy no-object masked-MSE reduction runs in one batched Pallas call.
    bsz = y_nchw.shape[0]
    y_host = np.asarray(jax.device_get(y_nchw))          # single sync per head

    checks = np.zeros(y_host.shape, dtype=bool)
    checks[:, 0, :, :] = True
    checks[:, 5 + C, :, :] = True
    checks[:, 2 * (5 + C), :, :] = True

    box_loss = 0.0
    for bi in range(bsz):
        x = y_host[bi]                                    # (Nc, Sf, Sf)
        for abox in boxes[bi]:
            cls, bx, by, bw, bh = [float(v) for v in abox]
            index = _iou_index(bw, bh)
            if s_index <= index <= e_index:
                now_index = index - s_index
                div = img_size / S
                index_x = int(bx / div)
                index_y = int(by / div)
                alpha_x = (bx - index_x * div) / div
                alpha_y = (by - index_y * div) / div
                base = now_index * (5 + C)
                checks[bi, base, index_x, index_y] = False
                now_x = x[:, index_x, index_y]
                res_ax = float(_sigmoid(now_x[base + 1]))
                res_ay = float(_sigmoid(now_x[base + 2]))
                res_w = float(ANCHORS[index][0] * np.exp(now_x[base + 3]))
                res_h = float(ANCHORS[index][1] * np.exp(now_x[base + 4]))
                iou_v = _iou(
                    [res_ax * div - res_w / 2, res_ay * div - res_h / 2,
                     res_ax * div + res_w / 2, res_ay * div + res_h / 2],
                    [alpha_x * div - bw / 2, alpha_y * div - bh / 2,
                     alpha_x * div + bw / 2, alpha_y * div + bh / 2])
                hot = np.zeros((C,), np.float32)
                hot[int(cls)] = 1.0
                label = _sigmoid(now_x[base + 5: base + 5 + C])
                box_loss += lambda_coord * float((now_x[base] - iou_v) ** 2)
                box_loss += float(np.mean((label - hot) ** 2))
                box_loss += float((res_ax - alpha_x) ** 2)
                box_loss += float((res_ay - alpha_y) ** 2)
                box_loss += float((res_w / img_size - bw / img_size) ** 2)
                box_loss += float((res_h / img_size - bh / img_size) ** 2)

    counts = checks.reshape(bsz, -1).sum(axis=1).astype(np.float32)
    mask = jnp.asarray(checks.reshape(bsz, -1).astype(np.float32))
    ssq = _masked_ssq(y_nchw.reshape(bsz, -1), mask)      # one Pallas call
    noobj = jnp.sum(ssq / jnp.asarray(counts))
    return box_loss + lambda_noobj * noobj


# ----------------------------------------------------------------------------
# Full YoloV3 forward
# ----------------------------------------------------------------------------
def yolov3_forward(params, x_nchw, boxes, *, C, img_size,
                   lambda_coord=5.0, lambda_noobj=0.5):
    to_nchw = lambda t: jnp.transpose(t, (0, 3, 1, 2))
    p = params
    x = jnp.transpose(x_nchw, (0, 2, 3, 1))                # NCHW -> NHWC

    x = conv_bn_lrelu(x, p["conv1_0"], stride=1)
    x = conv_bn_lrelu(x, p["conv1_1"], stride=2)
    for rp in p["res1"]:
        x = residual_block(x, rp)
    x = conv_bn_lrelu(x, p["conv2"], stride=2)
    for rp in p["res2"]:
        x = residual_block(x, rp)
    x3 = conv_bn_lrelu(x, p["conv3"], stride=2)
    x = x3
    for rp in p["res3"]:
        x = residual_block(x, rp)
    x2 = conv_bn_lrelu(x, p["conv4"], stride=2)
    x = x2
    for rp in p["res4"]:
        x = residual_block(x, rp)
    x = conv_bn_lrelu(x, p["conv5"], stride=2)
    for rp in p["res5"]:
        x = residual_block(x, rp)
    x1 = x

    y1_1 = x1
    for cp in p["y1c1"]:
        y1_1 = conv_bn_lrelu(y1_1, cp, stride=1)
    y1 = conv_bn_lrelu(y1_1, p["y1c2_0"], stride=1)
    y1 = plain_conv(y1, p["y1c2_1"], stride=1)
    loss1 = yolo_loss(to_nchw(y1), boxes, 6, 8, 21, C, img_size,
                      lambda_coord, lambda_noobj)

    y2_1 = upsample2(conv_bn_lrelu(y1_1, p["y2c1"], stride=1))
    x2m = conv_bn_lrelu(x2, p["merge2"], stride=1)
    y2_1 = jnp.concatenate([y2_1, x2m], axis=-1)
    y2_2 = y2_1
    for cp in p["y2c2"]:
        y2_2 = conv_bn_lrelu(y2_2, cp, stride=1)
    y2 = conv_bn_lrelu(y2_2, p["y2c3_0"], stride=1)
    y2 = plain_conv(y2, p["y2c3_1"], stride=1)
    loss2 = yolo_loss(to_nchw(y2), boxes, 3, 5, 42, C, img_size,
                      lambda_coord, lambda_noobj)

    y3_1 = upsample2(conv_bn_lrelu(y2_2, p["y3c1"], stride=1))
    x3m = conv_bn_lrelu(x3, p["merge3"], stride=1)
    y3_1 = jnp.concatenate([y3_1, x3m], axis=-1)
    y3 = y3_1
    for cp in p["y3c2"]:
        y3 = conv_bn_lrelu(y3, cp, stride=1)
    y3 = conv_bn_lrelu(y3, p["y3c3_0"], stride=1)
    y3 = plain_conv(y3, p["y3c3_1"], stride=1)
    loss3 = yolo_loss(to_nchw(y3), boxes, 0, 2, 84, C, img_size,
                      lambda_coord, lambda_noobj)

    return jnp.reshape(loss1 + loss2 + loss3, (1,))


# ----------------------------------------------------------------------------
if __name__ == "__main__":
    C = 2               # number of classes (small)
    img_size = 64       # small image; heads come out at 2x2 / 4x4 / 8x8
    batch = 2

    key = jax.random.PRNGKey(0)
    kp, kx = jax.random.split(key)
    params = init_params(kp, C)
    x = jax.random.normal(kx, (batch, 3, img_size, img_size), jnp.float32)

    # boxes: per-sample list of [class, x, y, w, h] (grid indices stay inside
    # the small feature maps, as the reference code requires).
    boxes = [
        [[1.0, 3.0, 2.0, 30.0, 60.0],   # anchor idx 3 -> yolo2 head
         [1.0, 3.0, 5.0, 116.0, 90.0]], # anchor idx 6 -> yolo1 head
        [[0.0, 2.0, 4.0, 16.0, 30.0]],  # anchor idx 1 -> yolo3 head
    ]

    loss = yolov3_forward(params, x, boxes, C=C, img_size=img_size,
                          lambda_coord=5.0, lambda_noobj=0.5)
    loss = jax.block_until_ready(loss)
    assert loss.shape == (1,) and bool(jnp.all(jnp.isfinite(loss)))
    print("KERNEL_OK")
</pallas_src>

<mosaic_0001>
module attributes {stable_mosaic.version = 11 : i64} {
  func.func @_conv_pass1_kernel(%arg0: i32, %arg1: i32, %arg2: memref<512x128xbf16, #tpu.memory_space<vmem>>, %arg3: memref<128x128xbf16, #tpu.memory_space<vmem>>, %arg4: memref<512x128xf32, #tpu.memory_space<vmem>>, %arg5: memref<1x128xf32, #tpu.memory_space<vmem>>, %arg6: memref<1x128xf32, #tpu.memory_space<vmem>>) attributes {dimension_semantics = [#tpu.dimension_semantics<parallel>, #tpu.dimension_semantics<arbitrary>], iteration_bounds = array<i64: 1, 16>, scalar_prefetch = 0 : i64, scratch_operands = 0 : i64, tpu.core_type = #tpu.core_type<tc>, window_params = [{transform_indices = @transform_0, window_bounds = array<i64: 512, 128>}, {transform_indices = @transform_1, window_bounds = array<i64: 128, 128>}, {transform_indices = @transform_2, window_bounds = array<i64: 512, 128>}, {transform_indices = @transform_3, window_bounds = array<i64: 1, 128>}, {transform_indices = @transform_4, window_bounds = array<i64: 1, 128>}]} {
    %c0 = arith.constant 0 : index
    %c0_0 = arith.constant 0 : index
    %0 = vector.load %arg2[%c0, %c0_0] : memref<512x128xbf16, #tpu.memory_space<vmem>>, vector<512x128xbf16>
    %c0_1 = arith.constant 0 : index
    %c0_2 = arith.constant 0 : index
    %1 = vector.load %arg3[%c0_1, %c0_2] : memref<128x128xbf16, #tpu.memory_space<vmem>>, vector<128x128xbf16>
    %cst = arith.constant dense<0.000000e+00> : vector<512x128xf32>
    %2 = tpu.matmul %0, %1, %cst {dimension_numbers = #tpu.dot_dimension_numbers<[1], [0], [0], [1], [0, 0, 1, 1], [], []>} : vector<512x128xbf16>, vector<128x128xbf16>, vector<512x128xf32> -> vector<512x128xf32>
    %c0_3 = arith.constant 0 : index
    %c0_4 = arith.constant 0 : index
    %3 = vector.load %arg4[%c0_3, %c0_4] : memref<512x128xf32, #tpu.memory_space<vmem>>, vector<512x128xf32>
    tpu.vector_store %arg4[%c0_3, %c0_4], %2 {strides = array<i32>} : memref<512x128xf32, #tpu.memory_space<vmem>>, vector<512x128xf32>,
    %c0_i32 = arith.constant 0 : i32
    %4 = arith.cmpi eq, %arg1, %c0_i32 : i32
    %5 = arith.extui %4 : i1 to i32
    %c0_i32_5 = arith.constant 0 : i32
    %6 = arith.cmpi ne, %5, %c0_i32_5 : i32
    scf.if %6 {
      %cst_16 = arith.constant 0.000000e+00 : f32
      %18 = vector.broadcast %cst_16 : f32 to vector<1x128xf32>
      %c0_17 = arith.constant 0 : index
      %c0_18 = arith.constant 0 : index
      %19 = vector.load %arg5[%c0_17, %c0_18] : memref<1x128xf32, #tpu.memory_space<vmem>>, vector<1x128xf32>
      tpu.vector_store %arg5[%c0_17, %c0_18], %18 {strides = array<i32>} : memref<1x128xf32, #tpu.memory_space<vmem>>, vector<1x128xf32>,
      %cst_19 = arith.constant 0.000000e+00 : f32
      %20 = vector.broadcast %cst_19 : f32 to vector<1x128xf32>
      %c0_20 = arith.constant 0 : index
      %c0_21 = arith.constant 0 : index
      %21 = vector.load %arg6[%c0_20, %c0_21] : memref<1x128xf32, #tpu.memory_space<vmem>>, vector<1x128xf32>
      tpu.vector_store %arg6[%c0_20, %c0_21], %20 {strides = array<i32>} : memref<1x128xf32, #tpu.memory_space<vmem>>, vector<1x128xf32>,
    } else {
    }
    %c0_6 = arith.constant 0 : index
    %c0_7 = arith.constant 0 : index
    %7 = vector.load %arg5[%c0_6, %c0_7] : memref<1x128xf32, #tpu.memory_space<vmem>>, vector<1x128xf32>
    %cst_8 = arith.constant dense<0.000000e+00> : vector<128xf32>
    %8 = vector.multi_reduction <add>, %2, %cst_8 [0] : vector<512x128xf32> to vector<128xf32>
    %9 = vector.shape_cast %8 : vector<128xf32> to vector<1x128xf32>
    %10 = arith.addf %7, %9 : vector<1x128xf32>
    %c0_9 = arith.constant 0 : index
    %c0_10 = arith.constant 0 : index
    %11 = vector.load %arg5[%c0_9, %c0_10] : memref<1x128xf32, #tpu.memory_space<vmem>>, vector<1x128xf32>
    tpu.vector_store %arg5[%c0_9, %c0_10], %10 {strides = array<i32>} : memref<1x128xf32, #tpu.memory_space<vmem>>, vector<1x128xf32>,
    %c0_11 = arith.constant 0 : index
    %c0_12 = arith.constant 0 : index
    %12 = vector.load %arg6[%c0_11, %c0_12] : memref<1x128xf32, #tpu.memory_space<vmem>>, vector<1x128xf32>
    %13 = arith.mulf %2, %2 : vector<512x128xf32>
    %cst_13 = arith.constant dense<0.000000e+00> : vector<128xf32>
    %14 = vector.multi_reduction <add>, %13, %cst_13 [0] : vector<512x128xf32> to vector<128xf32>
    %15 = vector.shape_cast %14 : vector<128xf32> to vector<1x128xf32>
    %16 = arith.addf %12, %15 : vector<1x128xf32>
    %c0_14 = arith.constant 0 : index
    %c0_15 = arith.constant 0 : index
    %17 = vector.load %arg6[%c0_14, %c0_15] : memref<1x128xf32, #tpu.memory_space<vmem>>, vector<1x128xf32>
    tpu.vector_store %arg6[%c0_14, %c0_15], %16 {strides = array<i32>} : memref<1x128xf32, #tpu.memory_space<vmem>>, vector<1x128xf32>,
    return
  }
  func.func @transform_0(%arg0: i32, %arg1: i32) -> (i32, i32) {
    %c0_i32 = arith.constant 0 : i32
    %c0_i32_0 = arith.constant 0 : i32
    return %arg1, %c0_i32 : i32, i32
  }
  func.func @transform_1(%arg0: i32, %arg1: i32) -> (i32, i32) {
    %c0_i32 = arith.constant 0 : i32
    %c0_i32_0 = arith.constant 0 : i32
    return %c0_i32, %arg0 : i32, i32
  }
  func.func @transform_2(%arg0: i32, %arg1: i32) -> (i32, i32) {
    %c0_i32 = arith.constant 0 : i32
    return %arg1, %arg0 : i32, i32
  }
  func.func @transform_3(%arg0: i32, %arg1: i32) -> (i32, i32) {
    %c0_i32 = arith.constant 0 : i32
    %c0_i32_0 = arith.constant 0 : i32
    return %c0_i32, %arg0 : i32, i32
  }
  func.func @transform_4(%arg0: i32, %arg1: i32) -> (i32, i32) {
    %c0_i32 = arith.constant 0 : i32
    %c0_i32_0 = arith.constant 0 : i32
    return %c0_i32, %arg0 : i32, i32
  }
}

</mosaic_0001>

<bundles_post_ra>
// kernel: _conv_pass1_call.1
= control target key start
LH: loop header
LB: loop body
LE: loop exit
PB: predicated region body
PF: predicated region fallthrough
CT: control target
= control target key end

     0   :  { %10 = vsyncpa [#allocation3], 0  ;;  %s2628_s0 = inlined_call_operand.hbm [shape: bf16[8192,128], index: 0, kind: input, shape index: {}]   ;;  %s2629_s1 = inlined_call_operand.hbm [shape: bf16[128,128], index: 1, kind: input, shape index: {}]   ;;  %s2630_s2 = inlined_call_operand.hbm [shape: f32[8192,128], index: 2, kind: output, shape index: {0}]   ;;  %s2631_s3 = inlined_call_operand.hbm [shape: f32[1,128], index: 3, kind: output, shape index: {1}]   ;;  %s2632_s4 = inlined_call_operand.hbm [shape: f32[1,128], index: 4, kind: output, shape index: {2}]  }
   0x1   :  { %12 = vsyncpa [#allocation3 + $0x1], 0 }
   0x2   :  { %13 = vsyncpa [#allocation6], 0 }
   0x3   :  { %14 = vsyncpa [#allocation4], 0 }
   0x4   :  { %16 = vsyncpa [#allocation4 + $0x1], 0 }
   0x5   :  { %17 = vsyncpa [#allocation9], 0  ;;  %s1878_s15 = smov 0   ;;  %s1880_s16 = smov 0  }
   0x6   :  { %s1882_s17 = smov 0   ;;  %s1884_s18 = smov 0  }
   0x7   :  { %s1886_s19 = smov 0   ;;  %s1888_s20 = smov 0  }
   0x8 LB: > { %s1309_s21 = sadd.s32 4294967295, %s1841_s20   ;;  %s1310_s22 = sadd.s32 4294967294, %s1841_s20   ;;  %s1841_s20 = sphi %s1888_s20, %s23_s20   ;;  %s1837_s19 = sphi %s1886_s19, %s2699_s19   ;;  %s1833_s18 = sphi %s1884_s18, %s2698_s18   ;;  %s1829_s17 = sphi %s1882_s17, %s2697_s17   ;;  %s1825_s16 = sphi %s1880_s16, %s2696_s16   ;;  %s1821_s15 = sphi %s1878_s15, %s2695_s15  }
   0x9   : > { %p55_p0 = scmp.ne.s32.totalorder %s1825_s16, %s1821_s15  ;;  %p1912_p1 = scmp.eq.s32.totalorder %s1309_s21, 0 }
   0xa   : > { %p1916_p2 = scmp.eq.s32.totalorder %s1309_s21, 15  ;;  %p113_p3 = scmp.eq.s32.totalorder %s1310_s22, 15 }
   0xb   : > { %s2659_s23 = scalar_select %p1912_p1, 1, 0 }
   0xc   : > { %s2660_s24 = scalar_select %p1916_p2, 1, 0 }
   0xd   : > { %p1922_p4 = por %p1912_p1, %p55_p0  ;;  %p1311_p5 = scmp.ge.s32.totalorder %s1841_s20, 1 }
   0xe   : > { %p1927_p6 = por %p113_p3, %p55_p0  ;;  %p172_p7 = scmp.lt.s32.totalorder %s1841_s20, 17 }
   0xf   : > { %s2661_s25 = scalar_select %p1922_p4, 1, 0 }
  0x10   : > { %s2662_s26 = scalar_select %p1927_p6, 1, 0 }
  0x11   : > { %p1932_p8 = pnand %p1311_p5, %p172_p7  ;;  %s1843_s28 = smov [#allocation5]  }
  0x12   : > { %s186_s29 = sshll.u32 %s1843_s28, 4  ;;  %s32_s5 = sadd.s32 1, %s1837_s19  ;;  %s187_s29 = int_to_ptr.vmem [resolvable:$true] %s186_s29 }
  0x13   : > { %s2663_s27 = scalar_select %p1932_p8, 1, 0 }
  0x14   : > { %p1525_p9 = pneg %p1932_p8  ;;  %s1641_s8 = scalar_lea.hbm %s2629_s1, 1024 }
  0x15   : > { %p1642_p11 = scmp.ne.s32.totalorder %s2629_s1, %s1641_s8  ;;  %p1648_p3 = scmp.lt.u32.totalorder %s1641_s8, %s2629_s1 }
  0x16   : > { %p1940_p10 = pnand %p1525_p9, %p1912_p1 }
  0x18   : > { %p1643_p12 = pneg %p1940_p10 }
  0x1a   : > { %p1644_p13 = pnand %p1643_p12, %p1642_p11 }
  0x1c   : > { %p1645_p0 = pneg %p1644_p13 }
  0x1e   : > { %p1650_p5 = pnand %p1648_p3, %p1645_p0 }
  0x20   : > { %1653 = shalt.err (!%p1650_p5)
}
  0x21   : > { %s1654_s13 = scalar_lea.vmem %s187_s29, 1024  ;;  %p1662_p1 = scmp.lt.s32.totalorder %s187_s29, %s187_s29 }
  0x22   : > { %p1655_p7 = scmp.ne.s32.totalorder %s187_s29, %s1654_s13  ;;  %p1663_p4 = scmp.lt.s32.totalorder %s1654_s13, %s1654_s13 }
  0x24   : > { %p1657_p9 = pnand %p1655_p7, %p1643_p12  ;;  %p1664_p8 = por %p1663_p4, %p1662_p1 }
  0x26   : > { %p1658_p6 = pneg %p1657_p9 }
  0x28   : > { %p1665_p2 = pnand %p1664_p8, %p1658_p6 }
  0x2a   : > { %1668 = shalt.err (!%p1665_p2)
}
  0x2b   : > { %s2638_s14 = smov 64   ;;  %s1845_s21 = smov 4  }
  0x2c   : > { %1528 = dma.hbm_to_vmem [thread:$0]  (!%p1940_p10), %s2629_s1, 1024, %s187_s29, [#allocation6], %s2638_s14, %s2638_s14, %s1845_s21  }
  0x2d   : > { %p33_p1 = scmp.ge.s32.totalorder %s32_s5, 16  ;;  %s42_s6 = sadd.s32 1, %s1829_s17 }
  0x2e   : > { %p49_p2 = scmp.ne.s32.totalorder %s1829_s17, %s1825_s16  ;;  %p50_p4 = scmp.eq.s32.totalorder %s1841_s20, 0 }
  0x2f   : > { %s2701_s5 = smov (%p33_p1, %s32_s5), 0  ;;  %p2666_p8 = scmp.ne.s32.totalorder %s2660_s24, 0 }
  0x30   : > { %p1970_p6 = por %p50_p4, %p49_p2  ;;  %s39_s8 = ssub.s32 %s1837_s19, %s2701_s5 }
  0x31   : > { %p1976_p11 = por %p2666_p8, %p49_p2  ;;  %p1538_p12 = scmp.lt.s32.totalorder %s1841_s20, 16 }
  0x32   : > { %p40_p10 = scmp.eq.s32.totalorder %s39_s8, 0  ;;  %s200_s29 = sand.u32 1, %s1829_s17  }
  0x33   : > { %s1314_s9 = sshll.u32 %s200_s29, 8  ;;  %s1371_s11 = sshll.u32 %s1837_s19, 12 }
  0x34   : > { %s1985_s10 = scalar_select %p40_p10, %s1829_s17, %s42_s6  }
  0x35   : > { %s1991_s22 = scalar_lea.hbm %s2628_s0, %s1371_s11  ;;  %s204_s28 = scalar_lea.vmem [#allocation2], %s1314_s9 }
  0x36   : > { %s211_s14 = sshll.u32 %s204_s28, 4  ;;  %p1997_p13 = pnand %p1538_p12, %p1970_p6  ;;  %s1993_s14 = int_to_ptr.vmem [resolvable:$true] %s211_s14 }
  0x37   : > { %s2001_s6 = scalar_lea.sflag [#allocation3], %s200_s29  ;;  %s1669_s12 = scalar_lea.hbm %s1991_s22, 4096 }
  0x38   : > { %p1670_p0 = scmp.ne.s32.totalorder %s1991_s22, %s1669_s12  ;;  %p1671_p3 = pneg %p1997_p13 }
  0x39   : > { %s1674_s7 = scalar_lea.hbm %s2628_s0, 65536  ;;  %p1675_p9 = scmp.lt.u32.totalorder %s1991_s22, %s2628_s0 }
  0x3a   : > { %p1672_p5 = pnand %p1671_p3, %p1670_p0  ;;  %p1676_p1 = scmp.lt.u32.totalorder %s1674_s7, %s1669_s12 }
  0x3b   : > { %p1678_p4 = scmp.lt.u32.totalorder %s1669_s12, %s1991_s22 }
  0x3c   : > { %p1673_p7 = pneg %p1672_p5  ;;  %p1677_p2 = por %p1676_p1, %p1675_p9 }
  0x3e   : > { %p1679_p6 = por %p1678_p4, %p1677_p2 }
  0x40   : > { %p1680_p8 = pnand %p1679_p6, %p1673_p7 }
  0x42   : > { %1683 = shalt.err (!%p1680_p8)
}
  0x43   : > { %s1684_s29 = scalar_lea.vmem %s1993_s14, 4096  ;;  %s1846_s9 = smov [#allocation2]  }
  0x44   : > { %p1685_p12 = scmp.ne.s32.totalorder %s1993_s14, %s1684_s29  ;;  %s1689_s11 = sshll.u32 %s1846_s9, 4  ;;  %s1690_s11 = int_to_ptr.vmem [resolvable:$false] %s1689_s11 }
  0x45   : > { %s1691_s13 = scalar_lea.vmem %s1690_s11, 8192  ;;  %p1692_p5 = scmp.lt.s32.totalorder %s1993_s14, %s1690_s11 }
  0x46   : > { %p1687_p10 = pnand %p1685_p12, %p1671_p3  ;;  %p1693_p9 = scmp.lt.s32.totalorder %s1691_s13, %s1684_s29 }
  0x48   : > { %p1688_p0 = pneg %p1687_p10  ;;  %p1694_p1 = por %p1693_p9, %p1692_p5 }
  0x4a   : > { %p1695_p2 = pnand %p1694_p1, %p1688_p0 }
  0x4c   : > { %1698 = shalt.err (!%p1695_p2)
}
  0x4d   : > { %s2669_s12 = smov 64   ;;  %p2670_p3 = scmp.ne.s32.totalorder %s2663_s27, 0 }
  0x4e   : > { %1532 = dma.hbm_to_vmem [thread:$0]  (!%p1997_p13), %s1991_s22, 4096, %s1993_s14, %s2001_s6, %s2669_s12, %s2669_s12, %s1845_s21  }
  0x4f   : > { %223 = sbr.rel (%p2670_p3) target bundleno = 595 (0x253), region = 28 }
  0x56   : > { %s2035_s7 = sand.u32 1, %s1825_s16   ;;  %p2671_p7 = scmp.ne.s32.totalorder %s2661_s25, 0 }
  0x57   : > { %s1318_s28 = sshll.u32 %s2035_s7, 8  ;;  %s226_s29 = scalar_lea.sflag [#allocation3], %s2035_s7 }
  0x58   : > { %s2039_s9 = scalar_lea.vmem [#allocation2], %s1318_s28 }
  0x59   : > { %1804 = dma.done.wait (%p2671_p7), %s226_s29, 4096  }
  0x5a   : > { %1806 = vsyncadd (%p2671_p7), %s226_s29, 4294963200  ;;  %p2672_p13 = scmp.ne.s32.totalorder %s2659_s23, 0 }
  0x5c   : > { %1808 = dma.done.wait (%p2672_p13), [#allocation6], 1024  }
  0x5d   : > { %1810 = vsyncadd (%p2672_p13), [#allocation6], 4294966272  ;;  %v1601_v0 = vld [vmem:[#allocation5] sm:$0xff]   ;;  %v1602_v1 = vld [vmem:[#allocation5 + $0x8] sm:$0xff]   ;;  %s1320_s23 = sshll.u32 %s2035_s7, 9  ;;  %p1361_p4 = scmp.ne.s32.totalorder %s1833_s18, 0 }
  0x5e   : > { %1413 = vmatprep.subr.bf16.mxu0 %v1601_v0  ;;  %1493 = vmatprep.subr.bf16.mxu1 %v1601_v0  ;;  %v1603_v2 = vld [vmem:[#allocation5 + $0x10] sm:$0xff]   ;;  %v1604_v3 = vld [vmem:[#allocation5 + $0x18] sm:$0xff]   ;;  %v1609_v4 = vld [vmem:[%s2039_s9] sm:$0xff]   ;;  %s2086_s25 = scalar_lea.vmem [#allocation7], %s1320_s23 }
  0x5f   : > { %1414 = vmatpush3.bf16.msra.mxu0 %v1601_v0  ;;  %1501 = vmatpush3.bf16.msra.mxu1 %v1601_v0  ;;  %v1610_v5 = vld [vmem:[%s2039_s9 + $0x80] sm:$0xff]   ;;  %v1606_v7 = vld [vmem:[#allocation5 + $0x28] sm:$0xff]   ;;  %v1607_v8 = vld [vmem:[#allocation5 + $0x30] sm:$0xff]  }
  0x60   : > { %1415 = vmatprep.subr.bf16.mxu0 %v1602_v1  ;;  %1494 = vmatprep.subr.bf16.mxu1 %v1602_v1  ;;  %v1605_v6 = vld [vmem:[#allocation5 + $0x20] sm:$0xff]   ;;  %v1608_v9 = vld [vmem:[#allocation5 + $0x38] sm:$0xff]   ;;  %v1611_v10 = vld [vmem:[%s2039_s9 + $0x8] sm:$0xff]  }
  0x61   : > { %1429 = vmatprep.mubr.bf16.mxu0 %v1609_v4  ;;  %1461 = vmatprep.mubr.bf16.mxu1 %v1610_v5  ;;  %v1612_v11 = vld [vmem:[%s2039_s9 + $0x88] sm:$0xff]   ;;  %v1613_v12 = vld [vmem:[%s2039_s9 + $0x10] sm:$0xff]   ;;  %v1615_v14 = vld [vmem:[%s2039_s9 + $0x18] sm:$0xff]  }
  0x62   : > { %v1614_v13 = vld [vmem:[%s2039_s9 + $0x90] sm:$0xff]   ;;  %v1616_v15 = vld [vmem:[%s2039_s9 + $0x98] sm:$0xff]   ;;  %v1617_v16 = vld [vmem:[%s2039_s9 + $0x20] sm:$0xff]  }
  0x63   : > { %1416 = vmatpush3.bf16.msra.mxu0 %v1602_v1  ;;  %1502 = vmatpush3.bf16.msra.mxu1 %v1602_v1  ;;  %v1618_v17 = vld [vmem:[%s2039_s9 + $0xa0] sm:$0xff]   ;;  %v1619_v18 = vld [vmem:[%s2039_s9 + $0x28] sm:$0xff]   ;;  %v1621_v20 = vld [vmem:[%s2039_s9 + $0x30] sm:$0xff]  }
  0x64   : > { %1417 = vmatprep.subr.bf16.mxu0 %v1603_v2  ;;  %1495 = vmatprep.subr.bf16.mxu1 %v1603_v2  ;;  %v1620_v19 = vld [vmem:[%s2039_s9 + $0xa8] sm:$0xff]   ;;  %v1622_v21 = vld [vmem:[%s2039_s9 + $0xb0] sm:$0xff]   ;;  %v1623_v22 = vld [vmem:[%s2039_s9 + $0x38] sm:$0xff]  }
  0x65   : > { %v1624_v23 = vld [vmem:[%s2039_s9 + $0xb8] sm:$0xff]   ;;  %v1625_v24 = vld [vmem:[%s2039_s9 + $0x40] sm:$0xff]   ;;  %v1627_v26 = vld [vmem:[%s2039_s9 + $0x48] sm:$0xff]  }
  0x66   : > { %v1626_v25 = vld [vmem:[%s2039_s9 + $0xc0] sm:$0xff]   ;;  %v1628_v27 = vld [vmem:[%s2039_s9 + $0xc8] sm:$0xff]   ;;  %v1629_v28 = vld [vmem:[%s2039_s9 + $0x50] sm:$0xff]  }
  0x67   : > { %1418 = vmatpush3.bf16.msra.mxu0 %v1603_v2  ;;  %1503 = vmatpush3.bf16.msra.mxu1 %v1603_v2  ;;  %v1630_v29 = vld [vmem:[%s2039_s9 + $0xd0] sm:$0xff]   ;;  %v1631_v30 = vld [vmem:[%s2039_s9 + $0x58] sm:$0xff]   ;;  %v1633_v32 = vld [vmem:[%s2039_s9 + $0x60] sm:$0xff]  }
  0x68   : > { %1419 = vmatprep.subr.bf16.mxu0 %v1604_v3  ;;  %1496 = vmatprep.subr.bf16.mxu1 %v1604_v3  ;;  %v1632_v31 = vld [vmem:[%s2039_s9 + $0xd8] sm:$0xff]   ;;  %v1634_v33 = vld [vmem:[%s2039_s9 + $0xe0] sm:$0xff]   ;;  %v1635_v34 = vld [vmem:[%s2039_s9 + $0x68] sm:$0xff]  }
  0x69   : > { %v1636_v35 = vld [vmem:[%s2039_s9 + $0xe8] sm:$0xff]   ;;  %v1637_v36 = vld [vmem:[%s2039_s9 + $0x70] sm:$0xff]   ;;  %v1639_v38 = vld [vmem:[%s2039_s9 + $0x78] sm:$0xff]  }
  0x6a   : > { %v1638_v37 = vld [vmem:[%s2039_s9 + $0xf0] sm:$0xff]   ;;  %v1640_v39 = vld [vmem:[%s2039_s9 + $0xf8] sm:$0xff]  }
  0x6b   : > { %1420 = vmatpush3.bf16.msra.mxu0 %v1604_v3  ;;  %1504 = vmatpush3.bf16.msra.mxu1 %v1604_v3 }
  0x6c   : > { %1421 = vmatprep.subr.bf16.mxu0 %v1605_v6  ;;  %1497 = vmatprep.subr.bf16.mxu1 %v1605_v6 }
  0x6f   : > { %1422 = vmatpush3.bf16.msra.mxu0 %v1605_v6  ;;  %1505 = vmatpush3.bf16.msra.mxu1 %v1605_v6 }
  0x70   : > { %1423 = vmatprep.subr.bf16.mxu0 %v1606_v7  ;;  %1498 = vmatprep.subr.bf16.mxu1 %v1606_v7 }
  0x73   : > { %1424 = vmatpush3.bf16.msra.mxu0 %v1606_v7  ;;  %1506 = vmatpush3.bf16.msra.mxu1 %v1606_v7 }
  0x74   : > { %1425 = vmatprep.subr.bf16.mxu0 %v1607_v8  ;;  %1499 = vmatprep.subr.bf16.mxu1 %v1607_v8 }
  0x77   : > { %1426 = vmatpush3.bf16.msra.mxu0 %v1607_v8  ;;  %1507 = vmatpush3.bf16.msra.mxu1 %v1607_v8 }
  0x78   : > { %1427 = vmatprep.subr.bf16.mxu0 %v1608_v9  ;;  %1500 = vmatprep.subr.bf16.mxu1 %v1608_v9 }
  0x7b   : > { %1428 = vmatpush3.bf16.msra.mxu0 %v1608_v9  ;;  %1508 = vmatpush3.bf16.msra.mxu1 %v1608_v9 }
  0x7e   : > { %1430 = vmatmul.mubr.bf16.vlgmr.msra.gmra.mrb[0].mxu0 %v1611_v10  ;;  %1462 = vmatmul.mubr.bf16.vlgmr.msra.gmra.mrb[0].mxu1 %v1612_v11 }
  0x7f   : > { %1433 = vmatprep.mubr.bf16.mxu0 %v1613_v12  ;;  %1465 = vmatprep.mubr.bf16.mxu1 %v1614_v13 }
  0x86   : > { %1434 = vmatmul.mubr.bf16.gmra.mrb[4].mxu0 %v1615_v14  ;;  %1466 = vmatmul.mubr.bf16.gmra.mrb[4].mxu1 %v1616_v15 }
  0x87   : > { %1437 = vmatprep.mubr.bf16.mxu0 %v1617_v16  ;;  %1469 = vmatprep.mubr.bf16.mxu1 %v1618_v17 }
  0x8e   : > { %1438 = vmatmul.mubr.bf16.gmra.mrb[8].mxu0 %v1619_v18  ;;  %1470 = vmatmul.mubr.bf16.gmra.mrb[8].mxu1 %v1620_v19 }
  0x8f   : > { %1441 = vmatprep.mubr.bf16.mxu0 %v1621_v20  ;;  %1473 = vmatprep.mubr.bf16.mxu1 %v1622_v21 }
  0x96   : > { %1442 = vmatmul.mubr.bf16.gmra.mrb[12].mxu0 %v1623_v22  ;;  %1474 = vmatmul.mubr.bf16.gmra.mrb[12].mxu1 %v1624_v23 }
  0x97   : > { %1445 = vmatprep.mubr.bf16.mxu0 %v1625_v24  ;;  %1477 = vmatprep.mubr.bf16.mxu1 %v1626_v25 }
  0x9e   : > { %1446 = vmatmul.mubr.bf16.gmra.mrb[16].mxu0 %v1627_v26  ;;  %1478 = vmatmul.mubr.bf16.gmra.mrb[16].mxu1 %v1628_v27 }
  0x9f   : > { %1449 = vmatprep.mubr.bf16.mxu0 %v1629_v28  ;;  %1481 = vmatprep.mubr.bf16.mxu1 %v1630_v29 }
  0xa6   : > { %1450 = vmatmul.mubr.bf16.gmra.mrb[20].mxu0 %v1631_v30  ;;  %1482 = vmatmul.mubr.bf16.gmra.mrb[20].mxu1 %v1632_v31 }
  0xa7   : > { %1453 = vmatprep.mubr.bf16.mxu0 %v1633_v32  ;;  %1485 = vmatprep.mubr.bf16.mxu1 %v1634_v33 }
  0xae   : > { %1454 = vmatmul.mubr.bf16.gmra.mrb[24].mxu0 %v1635_v34  ;;  %1486 = vmatmul.mubr.bf16.gmra.mrb[24].mxu1 %v1636_v35 }
  0xaf   : > { %1457 = vmatprep.mubr.bf16.mxu0 %v1637_v36  ;;  %1489 = vmatprep.mubr.bf16.mxu1 %v1638_v37 }
  0xb6   : > { %1458 = vmatmul.mubr.bf16.gmra.mrb[28].mxu0 %v1639_v38  ;;  %1490 = vmatmul.mubr.bf16.gmra.mrb[28].mxu1 %v1640_v39 }
 0x151   : > { %v2082_v40 = vpop.f32.mrb[0].mxu0  ;;  %v2084_v41 = vpop.f32.mrb[0].mxu1 }
 0x152   : > { %872 = vst [vmem:[%s2086_s25 + $0x10] sm:$0xff] %v2082_v40  ;;  %904 = vst [vmem:[%s2086_s25 + $0x110] sm:$0xff] %v2084_v41  ;;  %v2092_v42 = vpop.f32.mrb[1].mxu0  ;;  %v2094_v43 = vpop.f32.mrb[1].mxu1 }
 0x153   : > { %870 = vst [vmem:[%s2086_s25] sm:$0xff] %v2092_v42  ;;  %902 = vst [vmem:[%s2086_s25 + $0x100] sm:$0xff] %v2094_v43  ;;  %v2100_v44 = vpop.f32.mrb[2].mxu0  ;;  %v2102_v45 = vpop.f32.mrb[2].mxu1 }
 0x154   : > { %873 = vst [vmem:[%s2086_s25 + $0x18] sm:$0xff] %v2100_v44  ;;  %905 = vst [vmem:[%s2086_s25 + $0x118] sm:$0xff] %v2102_v45  ;;  %v2108_v46 = vpop.f32.mrb[3].mxu0  ;;  %v2110_v47 = vpop.f32.mrb[3].mxu1 }
 0x155   : > { %871 = vst [vmem:[%s2086_s25 + $0x8] sm:$0xff] %v2108_v46  ;;  %903 = vst [vmem:[%s2086_s25 + $0x108] sm:$0xff] %v2110_v47 }
 0x159   : > { %v2116_v48 = vpop.f32.mrb[4].mxu0  ;;  %v2118_v49 = vpop.f32.mrb[4].mxu1 }
 0x15a   : > { %876 = vst [vmem:[%s2086_s25 + $0x30] sm:$0xff] %v2116_v48  ;;  %908 = vst [vmem:[%s2086_s25 + $0x130] sm:$0xff] %v2118_v49  ;;  %v2124_v50 = vpop.f32.mrb[5].mxu0  ;;  %v2126_v51 = vpop.f32.mrb[5].mxu1 }
 0x15b   : > { %874 = vst [vmem:[%s2086_s25 + $0x20] sm:$0xff] %v2124_v50  ;;  %906 = vst [vmem:[%s2086_s25 + $0x120] sm:$0xff] %v2126_v51  ;;  %v2132_v52 = vpop.f32.mrb[6].mxu0  ;;  %v2134_v53 = vpop.f32.mrb[6].mxu1 }
 0x15c   : > { %877 = vst [vmem:[%s2086_s25 + $0x38] sm:$0xff] %v2132_v52  ;;  %909 = vst [vmem:[%s2086_s25 + $0x138] sm:$0xff] %v2134_v53  ;;  %v2140_v54 = vpop.f32.mrb[7].mxu0  ;;  %v2142_v55 = vpop.f32.mrb[7].mxu1 }
 0x15d   : > { %875 = vst [vmem:[%s2086_s25 + $0x28] sm:$0xff] %v2140_v54  ;;  %907 = vst [vmem:[%s2086_s25 + $0x128] sm:$0xff] %v2142_v55 }
 0x161   : > { %v2148_v56 = vpop.f32.mrb[8].mxu0  ;;  %v2150_v57 = vpop.f32.mrb[8].mxu1 }
 0x162   : > { %880 = vst [vmem:[%s2086_s25 + $0x50] sm:$0xff] %v2148_v56  ;;  %912 = vst [vmem:[%s2086_s25 + $0x150] sm:$0xff] %v2150_v57  ;;  %v2156_v58 = vpop.f32.mrb[9].mxu0  ;;  %v2158_v59 = vpop.f32.mrb[9].mxu1 }
 0x163   : > { %878 = vst [vmem:[%s2086_s25 + $0x40] sm:$0xff] %v2156_v58  ;;  %910 = vst [vmem:[%s2086_s25 + $0x140] sm:$0xff] %v2158_v59  ;;  %v2164_v60 = vpop.f32.mrb[10].mxu0  ;;  %v2166_v61 = vpop.f32.mrb[10].mxu1 }
 0x164   : > { %881 = vst [vmem:[%s2086_s25 + $0x58] sm:$0xff] %v2164_v60  ;;  %913 = vst [vmem:[%s2086_s25 + $0x158] sm:$0xff] %v2166_v61  ;;  %v2172_v62 = vpop.f32.mrb[11].mxu0  ;;  %v2174_v63 = vpop.f32.mrb[11].mxu1 }
 0x165   : > { %879 = vst [vmem:[%s2086_s25 + $0x48] sm:$0xff] %v2172_v62  ;;  %911 = vst [vmem:[%s2086_s25 + $0x148] sm:$0xff] %v2174_v63 }
 0x169   : > { %v2180_v0 = vpop.f32.mrb[12].mxu0  ;;  %v2182_v1 = vpop.f32.mrb[12].mxu1 }
 0x16a   : > { %884 = vst [vmem:[%s2086_s25 + $0x70] sm:$0xff] %v2180_v0  ;;  %916 = vst [vmem:[%s2086_s25 + $0x170] sm:$0xff] %v2182_v1  ;;  %v2188_v2 = vpop.f32.mrb[13].mxu0  ;;  %v2190_v3 = vpop.f32.mrb[13].mxu1 }
 0x16b   : > { %882 = vst [vmem:[%s2086_s25 + $0x60] sm:$0xff] %v2188_v2  ;;  %914 = vst [vmem:[%s2086_s25 + $0x160] sm:$0xff] %v2190_v3  ;;  %v2196_v4 = vpop.f32.mrb[14].mxu0  ;;  %v2198_v5 = vpop.f32.mrb[14].mxu1 }
 0x16c   : > { %885 = vst [vmem:[%s2086_s25 + $0x78] sm:$0xff] %v2196_v4  ;;  %917 = vst [vmem:[%s2086_s25 + $0x178] sm:$0xff] %v2198_v5  ;;  %v2204_v6 = vpop.f32.mrb[15].mxu0  ;;  %v2206_v7 = vpop.f32.mrb[15].mxu1 }
 0x16d   : > { %883 = vst [vmem:[%s2086_s25 + $0x68] sm:$0xff] %v2204_v6  ;;  %915 = vst [vmem:[%s2086_s25 + $0x168] sm:$0xff] %v2206_v7 }
 0x171   : > { %v2212_v8 = vpop.f32.mrb[16].mxu0  ;;  %v2214_v9 = vpop.f32.mrb[16].mxu1 }
 0x172   : > { %888 = vst [vmem:[%s2086_s25 + $0x90] sm:$0xff] %v2212_v8  ;;  %920 = vst [vmem:[%s2086_s25 + $0x190] sm:$0xff] %v2214_v9  ;;  %v2220_v10 = vpop.f32.mrb[17].mxu0  ;;  %v2222_v11 = vpop.f32.mrb[17].mxu1 }
 0x173   : > { %886 = vst [vmem:[%s2086_s25 + $0x80] sm:$0xff] %v2220_v10  ;;  %918 = vst [vmem:[%s2086_s25 + $0x180] sm:$0xff] %v2222_v11  ;;  %v2228_v12 = vpop.f32.mrb[18].mxu0  ;;  %v2230_v13 = vpop.f32.mrb[18].mxu1 }
 0x174   : > { %889 = vst [vmem:[%s2086_s25 + $0x98] sm:$0xff] %v2228_v12  ;;  %921 = vst [vmem:[%s2086_s25 + $0x198] sm:$0xff] %v2230_v13  ;;  %v2236_v14 = vpop.f32.mrb[19].mxu0  ;;  %v2238_v15 = vpop.f32.mrb[19].mxu1 }
 0x175   : > { %887 = vst [vmem:[%s2086_s25 + $0x88] sm:$0xff] %v2236_v14  ;;  %919 = vst [vmem:[%s2086_s25 + $0x188] sm:$0xff] %v2238_v15 }
 0x179   : > { %v2244_v16 = vpop.f32.mrb[20].mxu0  ;;  %v2246_v17 = vpop.f32.mrb[20].mxu1 }
 0x17a   : > { %2673 = vst [vmem:[#allocation15_spill] sm:$0xff] %v2246_v17  ;;  %892 = vst [vmem:[%s2086_s25 + $0xb0] sm:$0xff] %v2244_v16  ;;  %v2252_v18 = vpop.f32.mrb[21].mxu0  ;;  %v2254_v19 = vpop.f32.mrb[21].mxu1 }
 0x17b   : > { %924 = vst [vmem:[%s2086_s25 + $0x1b0] sm:$0xff] %v2246_v17  ;;  %890 = vst [vmem:[%s2086_s25 + $0xa0] sm:$0xff] %v2252_v18  ;;  %v2260_v20 = vpop.f32.mrb[22].mxu0  ;;  %v2262_v21 = vpop.f32.mrb[22].mxu1 }
 0x17c   : > { %922 = vst [vmem:[%s2086_s25 + $0x1a0] sm:$0xff] %v2254_v19  ;;  %2674 = vst [vmem:[#allocation16_spill] sm:$0xff] %v2262_v21  ;;  %v2268_v22 = vpop.f32.mrb[23].mxu0  ;;  %v2270_v23 = vpop.f32.mrb[23].mxu1 }
 0x17d   : > { %893 = vst [vmem:[%s2086_s25 + $0xb8] sm:$0xff] %v2260_v20  ;;  %925 = vst [vmem:[%s2086_s25 + $0x1b8] sm:$0xff] %v2262_v21 }
 0x17e   : > { %891 = vst [vmem:[%s2086_s25 + $0xa8] sm:$0xff] %v2268_v22  ;;  %923 = vst [vmem:[%s2086_s25 + $0x1a8] sm:$0xff] %v2270_v23 }
 0x181   : > { %v2276_v24 = vpop.f32.mrb[24].mxu0  ;;  %v2278_v25 = vpop.f32.mrb[24].mxu1 }
 0x182   : > { %2675 = vst [vmem:[#allocation17_spill] sm:$0xff] %v2278_v25  ;;  %896 = vst [vmem:[%s2086_s25 + $0xd0] sm:$0xff] %v2276_v24  ;;  %v2284_v26 = vpop.f32.mrb[25].mxu0  ;;  %v2286_v27 = vpop.f32.mrb[25].mxu1 }
 0x183   : > { %928 = vst [vmem:[%s2086_s25 + $0x1d0] sm:$0xff] %v2278_v25  ;;  %2676 = vst [vmem:[#allocation18_spill] sm:$0xff] %v2286_v27  ;;  %v2292_v28 = vpop.f32.mrb[26].mxu0  ;;  %v2294_v29 = vpop.f32.mrb[26].mxu1 }
 0x184   : > { %894 = vst [vmem:[%s2086_s25 + $0xc0] sm:$0xff] %v2284_v26  ;;  %926 = vst [vmem:[%s2086_s25 + $0x1c0] sm:$0xff] %v2286_v27  ;;  %v2300_v30 = vpop.f32.mrb[27].mxu0  ;;  %v2302_v31 = vpop.f32.mrb[27].mxu1 }
 0x185   : > { %2677 = vst [vmem:[#allocation19_spill] sm:$0xff] %v2294_v29  ;;  %897 = vst [vmem:[%s2086_s25 + $0xd8] sm:$0xff] %v2292_v28 }
 0x186   : > { %929 = vst [vmem:[%s2086_s25 + $0x1d8] sm:$0xff] %v2294_v29  ;;  %2678 = vst [vmem:[#allocation20_spill] sm:$0xff] %v2302_v31 }
 0x187   : > { %895 = vst [vmem:[%s2086_s25 + $0xc8] sm:$0xff] %v2300_v30  ;;  %927 = vst [vmem:[%s2086_s25 + $0x1c8] sm:$0xff] %v2302_v31 }
 0x189   : > { %v2308_v32 = vpop.f32.mrb[28].mxu0  ;;  %v2310_v33 = vpop.f32.mrb[28].mxu1  ;;  %937 = sbr.rel (%p1361_p4) target bundleno = 401 (0x191), region = 40 }
 0x18a   : > { %2679 = vst [vmem:[#allocation21_spill] sm:$0xff] %v2310_v33  ;;  %900 = vst [vmem:[%s2086_s25 + $0xf0] sm:$0xff] %v2308_v32  ;;  %v2316_v34 = vpop.f32.mrb[29].mxu0  ;;  %v2318_v35 = vpop.f32.mrb[29].mxu1 }
 0x18b   : > { %932 = vst [vmem:[%s2086_s25 + $0x1f0] sm:$0xff] %v2310_v33  ;;  %2680 = vst [vmem:[#allocation22_spill] sm:$0xff] %v2318_v35  ;;  %v2324_v36 = vpop.f32.mrb[30].mxu0  ;;  %v2326_v37 = vpop.f32.mrb[30].mxu1  ;;  %v1847_v33 = vmov (!%p1361_p4), 0.0  }
 0x18c   : > { %898 = vst [vmem:[%s2086_s25 + $0xe0] sm:$0xff] %v2316_v34  ;;  %930 = vst [vmem:[%s2086_s25 + $0x1e0] sm:$0xff] %v2318_v35  ;;  %v2332_v38 = vpop.f32.mrb[31].mxu0  ;;  %v2334_v39 = vpop.f32.mrb[31].mxu1 }
 0x18d   : > { %2681 = vst [vmem:[#allocation23_spill] sm:$0xff] %v2326_v37  ;;  %901 = vst [vmem:[%s2086_s25 + $0xf8] sm:$0xff] %v2324_v36 }
 0x18e   : > { %933 = vst [vmem:[%s2086_s25 + $0x1f8] sm:$0xff] %v2326_v37  ;;  %2682 = vst [vmem:[#allocation24_spill] sm:$0xff] %v2334_v39 }
 0x18f   : > { %899 = vst [vmem:[%s2086_s25 + $0xe8] sm:$0xff] %v2332_v38  ;;  %931 = vst [vmem:[%s2086_s25 + $0x1e8] sm:$0xff] %v2334_v39 }
 0x190   : > { %938 = vst [vmem:[#allocation8] sm:$0x1] %v1847_v33  ;;  %939 = vst [vmem:[#allocation10] sm:$0x1] %v1847_v33 }
 0x191 PF: > { %v941_v35 = vadd.f32 %v2108_v46, %v2092_v42  ;;  %v1013_v33 = vmul.f32 %v2092_v42, %v2092_v42  ;;  %v1014_v17 = vmul.f32 %v2108_v46, %v2108_v46  ;;  %v1017_v42 = vmul.f32 %v2124_v50, %v2124_v50  ;;  %s1372_s27 = sshll.u32 %s1833_s18, 13  ;;  %s1163_s8 = sshll.u32 %s2086_s25, 4  ;;  %s2388_s8 = int_to_ptr.vmem [resolvable:$true] %s1163_s8 }
 0x192   : > { %s2382_s22 = scalar_lea.hbm %s2630_s2, %s1372_s27  ;;  %s1149_s18 = scalar_lea.sflag [#allocation4], %s2035_s7 }
 0x193   : > { %v942_v37 = vadd.f32 %v2082_v40, %v941_v35  ;;  %s1699_s6 = scalar_lea.vmem %s2388_s8, 8192  ;;  %s1848_s11 = smov [#allocation7]  }
 0x194   : > { %p1700_p6 = scmp.ne.s32.totalorder %s2388_s8, %s1699_s6  ;;  %s1703_s13 = sshll.u32 %s1848_s11, 4  ;;  %s1704_s13 = int_to_ptr.vmem [resolvable:$false] %s1703_s13 }
 0x195   : > { %v943_v29 = vadd.f32 %v2100_v44, %v942_v37  ;;  %v1015_v37 = vmul.f32 %v2082_v40, %v2082_v40  ;;  %s1705_s12 = scalar_lea.vmem %s1704_s13, 16384  ;;  %p1706_p10 = scmp.lt.s32.totalorder %s2388_s8, %s1704_s13 }
 0x196   : > { %p1701_p8 = pnand %p1700_p6, %p1976_p11  ;;  %p1707_p0 = scmp.lt.s32.totalorder %s1705_s12, %s1699_s6 }
 0x197   : > { %v944_v25 = vadd.f32 %v943_v29, %v2124_v50  ;;  %v1020_v50 = vmul.f32 %v2132_v52, %v2132_v52 }
 0x198   : > { %p1702_p12 = pneg %p1701_p8  ;;  %p1708_p5 = por %p1707_p0, %p1706_p10 }
 0x199   : > { %v945_v31 = vadd.f32 %v944_v25, %v2140_v54  ;;  %v1016_v25 = vmul.f32 %v2100_v44, %v2100_v44  ;;  %v1019_v44 = vmul.f32 %v2116_v48, %v2116_v48 }
 0x19a   : > { %p1709_p9 = pnand %p1708_p5, %p1702_p12 }
 0x19b   : > { %v946_v39 = vadd.f32 %v2116_v48, %v945_v31  ;;  %v1077_v31 = vadd.f32 %v1014_v17, %v1013_v33  ;;  %v1022_v48 = vmul.f32 %v2172_v62, %v2172_v62 }
 0x19d   : > { %v947_v27 = vadd.f32 %v2132_v52, %v946_v39  ;;  %v1078_v39 = vadd.f32 %v1077_v31, %v1015_v37 }
 0x19f   : > { %v948_v21 = vadd.f32 %v947_v27, %v2156_v58  ;;  %v1079_v40 = vadd.f32 %v1078_v39, %v1016_v25 }
 0x1a1   : > { %v949_v35 = vadd.f32 %v948_v21, %v2172_v62  ;;  %v1018_v21 = vmul.f32 %v2140_v54, %v2140_v54  ;;  %v1080_v17 = vadd.f32 %v1079_v40, %v1017_v42  ;;  %v1021_v54 = vmul.f32 %v2156_v58, %v2156_v58 }
 0x1a2   : > { %v1023_v42 = vmul.f32 %v2148_v56, %v2148_v56 }
 0x1a3   : > { %v950_v29 = vadd.f32 %v2148_v56, %v949_v35  ;;  %v1081_v37 = vadd.f32 %v1080_v17, %v1018_v21 }
 0x1a5   : > { %v951_v27 = vadd.f32 %v2164_v60, %v950_v29  ;;  %v1082_v25 = vadd.f32 %v1081_v37, %v1019_v44 }
 0x1a7   : > { %v952_v46 = vadd.f32 %v951_v27, %v2188_v2  ;;  %v1083_v27 = vadd.f32 %v1082_v25, %v1020_v50 }
 0x1a9   : > { %v953_v35 = vadd.f32 %v952_v46, %v2204_v6  ;;  %v1084_v58 = vadd.f32 %v1083_v27, %v1021_v54 }
 0x1ab   : > { %v954_v33 = vadd.f32 %v2180_v0, %v953_v35 }
 0x1ad   : > { %v955_v29 = vadd.f32 %v2196_v4, %v954_v33 }
 0x1af   : > { %v956_v31 = vadd.f32 %v955_v29, %v2220_v10 }
 0x1b1   : > { %v957_v52 = vadd.f32 %v956_v31, %v2236_v14 }
 0x1b2   : > { %1712 = shalt.err (!%p1709_p9)
}
 0x1b3   : > { %s1713_s28 = scalar_lea.hbm %s2382_s22, 8192  ;;  %s1717_s23 = scalar_lea.hbm %s2630_s2, 131072 }
 0x1b4   : > { %p1714_p1 = scmp.ne.s32.totalorder %s2382_s22, %s1713_s28  ;;  %p1718_p7 = scmp.lt.u32.totalorder %s2382_s22, %s2630_s2 }
 0x1b5   : > { %p1719_p13 = scmp.lt.u32.totalorder %s1717_s23, %s1713_s28  ;;  %p1721_p6 = scmp.lt.u32.totalorder %s1713_s28, %s2382_s22 }
 0x1b6   : > { %p1715_p2 = pnand %p1714_p1, %p1976_p11 }
 0x1b7   : > { %p1720_p4 = por %p1719_p13, %p1718_p7 }
 0x1b8   : > { %p1716_p3 = pneg %p1715_p2 }
 0x1b9   : > { %p1722_p8 = por %p1721_p6, %p1720_p4 }
 0x1bb   : > { %p1723_p12 = pnand %p1722_p8, %p1716_p3 }
 0x1bd   : > { %1726 = shalt.err (!%p1723_p12)
}
 0x1be   : > { %s1849_s14 = smov 128   ;;  %s1850_s21 = smov 8   ;;  %v958_v56 = vadd.f32 %v2212_v8, %v957_v52  ;;  %v1024_v62 = vmul.f32 %v2164_v60, %v2164_v60  ;;  %v1085_v39 = vadd.f32 %v1084_v58, %v1022_v48  ;;  %v1025_v21 = vmul.f32 %v2188_v2, %v2188_v2 }
 0x1bf   : > { %1515 = dma.vmem_to_hbm [thread:$0]  (%p1976_p11), %s2388_s8, 8192, %s2382_s22, %s1149_s18, %s1849_s14, %s1849_s14, %s1850_s21   ;;  %v1026_v44 = vmul.f32 %v2204_v6, %v2204_v6  ;;  %v1027_v50 = vmul.f32 %v2180_v0, %v2180_v0  ;;  %v1028_v29 = vmul.f32 %v2196_v4, %v2196_v4  ;;  %v1029_v25 = vmul.f32 %v2220_v10, %v2220_v10 }
 0x1c0   : > { %v959_v46 = vadd.f32 %v2228_v12, %v958_v56  ;;  %v1086_v40 = vadd.f32 %v1085_v39, %v1023_v42  ;;  %v1030_v48 = vmul.f32 %v2236_v14, %v2236_v14  ;;  %v1031_v52 = vmul.f32 %v2212_v8, %v2212_v8  ;;  %s1851_s30 = smov [#allocation8]   ;;  %p2693_p10 = scmp.ne.s32.totalorder %s2660_s24, 0 }
 0x1c1   : > { %v1032_v58 = vmul.f32 %v2228_v12, %v2228_v12  ;;  %s1179_s7 = sshll.u32 %s1851_s30, 4  ;;  %s1180_s7 = int_to_ptr.vmem [resolvable:$true] %s1179_s7 }
 0x1c2   : > { %v960_v35 = vadd.f32 %v959_v46, %v2252_v18  ;;  %v1087_v17 = vadd.f32 %v1086_v40, %v1024_v62  ;;  %v1033_v62 = vmul.f32 %v2252_v18, %v2252_v18  ;;  %v1034_v46 = vmul.f32 %v2268_v22, %v2268_v22  ;;  %s1727_s22 = scalar_lea.vmem %s1180_s7, 16  ;;  %s1733_s8 = scalar_lea.vmem %s1180_s7, 32 }
 0x1c3   : > { %v1035_v40 = vmul.f32 %v2244_v16, %v2244_v16  ;;  %p1728_p11 = scmp.ne.s32.totalorder %s1180_s7, %s1727_s22  ;;  %p1734_p9 = scmp.lt.s32.totalorder %s1180_s7, %s1180_s7 }
 0x1c4   : > { %v961_v33 = vadd.f32 %v960_v35, %v2268_v22  ;;  %v1088_v37 = vadd.f32 %v1087_v17, %v1025_v21  ;;  %p1735_p1 = scmp.lt.s32.totalorder %s1733_s8, %s1727_s22 }
 0x1c5   : > { %p1729_p0 = pnand %p1728_p11, %p2693_p10 }
 0x1c6   : > { %v962_v60 = vadd.f32 %v2244_v16, %v961_v33  ;;  %v1089_v54 = vadd.f32 %v1088_v37, %v1026_v44  ;;  %v1036_v44 = vmul.f32 %v2260_v20, %v2260_v20  ;;  %v1037_v33 = vmul.f32 %v2284_v26, %v2284_v26  ;;  %p1736_p2 = por %p1735_p1, %p1734_p9 }
 0x1c7   : > { %v1038_v37 = vmul.f32 %v2300_v30, %v2300_v30  ;;  %p1730_p5 = pneg %p1729_p0 }
 0x1c8   : > { %v963_v2 = vadd.f32 %v2260_v20, %v962_v60  ;;  %v1090_v31 = vadd.f32 %v1089_v54, %v1027_v50 }
 0x1c9   : > { %p1737_p3 = pnand %p1736_p2, %p1730_p5 }
 0x1ca   : > { %v964_v6 = vadd.f32 %v963_v2, %v2284_v26  ;;  %v1091_v27 = vadd.f32 %v1090_v31, %v1028_v29  ;;  %v1039_v29 = vmul.f32 %v2276_v24, %v2276_v24  ;;  %v1040_v2 = vmul.f32 %v2292_v28, %v2292_v28 }
 0x1cb   : > { %v1041_v31 = vmul.f32 %v2316_v34, %v2316_v34 }
 0x1cc   : > { %v965_v0 = vadd.f32 %v964_v6, %v2300_v30  ;;  %v1092_v42 = vadd.f32 %v1091_v27, %v1029_v25 }
 0x1ce   : > { %v966_v4 = vadd.f32 %v2276_v24, %v965_v0  ;;  %v1093_v56 = vadd.f32 %v1092_v42, %v1030_v48  ;;  %v1042_v48 = vmul.f32 %v2332_v38, %v2332_v38  ;;  %v1043_v0 = vmul.f32 %v2308_v32, %v2308_v32 }
 0x1cf   : > { %v1044_v42 = vmul.f32 %v2324_v36, %v2324_v36 }
 0x1d0   : > { %v967_v10 = vadd.f32 %v2292_v28, %v966_v4  ;;  %v1094_v39 = vadd.f32 %v1093_v56, %v1031_v52 }
 0x1d2   : > { %v968_v14 = vadd.f32 %v967_v10, %v2316_v34  ;;  %v1095_v21 = vadd.f32 %v1094_v39, %v1032_v58  ;;  %v1045_v58 = vmul.f32 %v2094_v43, %v2094_v43  ;;  %v1046_v10 = vmul.f32 %v2110_v47, %v2110_v47 }
 0x1d3   : > { %v1047_v39 = vmul.f32 %v2084_v41, %v2084_v41 }
 0x1d4   : > { %v969_v8 = vadd.f32 %v968_v14, %v2332_v38  ;;  %v1096_v35 = vadd.f32 %v1095_v21, %v1033_v62 }
 0x1d6   : > { %v970_v12 = vadd.f32 %v2308_v32, %v969_v8  ;;  %v1097_v17 = vadd.f32 %v1096_v35, %v1034_v46  ;;  %v1048_v46 = vmul.f32 %v2102_v45, %v2102_v45  ;;  %v1049_v8 = vmul.f32 %v2126_v51, %v2126_v51 }
 0x1d7   : > { %v1050_v35 = vmul.f32 %v2142_v55, %v2142_v55 }
 0x1d8   : > { %v971_v18 = vadd.f32 %v2324_v36, %v970_v12  ;;  %v1098_v50 = vadd.f32 %v1097_v17, %v1035_v40 }
 0x1da   : > { %v972_v22 = vadd.f32 %v971_v18, %v2094_v43  ;;  %v1099_v60 = vadd.f32 %v1098_v50, %v1036_v44  ;;  %v1051_v44 = vmul.f32 %v2118_v49, %v2118_v49  ;;  %v1052_v18 = vmul.f32 %v2134_v53, %v2134_v53 }
 0x1db   : > { %v1053_v50 = vmul.f32 %v2158_v59, %v2158_v59 }
 0x1dc   : > { %v973_v16 = vadd.f32 %v972_v22, %v2110_v47  ;;  %v1100_v54 = vadd.f32 %v1099_v60, %v1037_v33 }
 0x1de   : > { %v974_v20 = vadd.f32 %v2084_v41, %v973_v16  ;;  %v1101_v25 = vadd.f32 %v1100_v54, %v1038_v37  ;;  %v1054_v37 = vmul.f32 %v2174_v63, %v2174_v63  ;;  %v1055_v16 = vmul.f32 %v2150_v57, %v2150_v57 }
 0x1df   : > { %v1056_v54 = vmul.f32 %v2166_v61, %v2166_v61 }
 0x1e0   : > { %v975_v26 = vadd.f32 %v2102_v45, %v974_v20  ;;  %v1102_v6 = vadd.f32 %v1101_v25, %v1039_v29 }
 0x1e2   : > { %v976_v30 = vadd.f32 %v975_v26, %v2126_v51  ;;  %v1103_v27 = vadd.f32 %v1102_v6, %v1040_v2  ;;  %v1057_v2 = vmul.f32 %v2190_v3, %v2190_v3  ;;  %v1058_v26 = vmul.f32 %v2206_v7, %v2206_v7 }
 0x1e3   : > { %v1059_v6 = vmul.f32 %v2182_v1, %v2182_v1 }
 0x1e4   : > { %v977_v24 = vadd.f32 %v976_v30, %v2142_v55  ;;  %v1104_v52 = vadd.f32 %v1103_v27, %v1041_v31  ;;  %v1060_v27 = vmul.f32 %v2198_v5, %v2198_v5 }
 0x1e6   : > { %v978_v28 = vadd.f32 %v2118_v49, %v977_v24  ;;  %v1105_v4 = vadd.f32 %v1104_v52, %v1042_v48  ;;  %v1061_v52 = vmul.f32 %v2222_v11, %v2222_v11 }
 0x1e8   : > { %v979_v34 = vadd.f32 %v2134_v53, %v978_v28  ;;  %v1106_v56 = vadd.f32 %v1105_v4, %v1043_v0  ;;  %v1062_v4 = vmul.f32 %v2238_v15, %v2238_v15 }
 0x1ea   : > { %v980_v38 = vadd.f32 %v979_v34, %v2158_v59  ;;  %v1107_v62 = vadd.f32 %v1106_v56, %v1044_v42  ;;  %v1063_v56 = vmul.f32 %v2214_v9, %v2214_v9 }
 0x1ec   : > { %v981_v32 = vadd.f32 %v980_v38, %v2174_v63  ;;  %v1108_v14 = vadd.f32 %v1107_v62, %v1045_v58  ;;  %v1064_v62 = vmul.f32 %v2230_v13, %v2230_v13 }
 0x1ee   : > { %v982_v36 = vadd.f32 %v2150_v57, %v981_v32  ;;  %v1109_v21 = vadd.f32 %v1108_v14, %v1046_v10  ;;  %v1065_v14 = vmul.f32 %v2254_v19, %v2254_v19 }
 0x1f0   : > { %v983_v43 = vadd.f32 %v2166_v61, %v982_v36  ;;  %v1110_v40 = vadd.f32 %v1109_v21, %v1047_v39  ;;  %v2683_v61 = vld [vmem:[#allocation15_spill] sm:$0xff]  ;;  %v1066_v21 = vmul.f32 %v2270_v23, %v2270_v23 }
 0x1f2   : > { %v984_v47 = vadd.f32 %v983_v43, %v2190_v3  ;;  %v1111_v12 = vadd.f32 %v1110_v40, %v1048_v46  ;;  %v2684_v3 = vld [vmem:[#allocation16_spill] sm:$0xff]  ;;  %v1067_v40 = vmul.f32 %v2683_v61, %v2683_v61 }
 0x1f4   : > { %v985_v41 = vadd.f32 %v984_v47, %v2206_v7  ;;  %v1112_v17 = vadd.f32 %v1111_v12, %v1049_v8  ;;  %v2685_v7 = vld [vmem:[#allocation18_spill] sm:$0xff]  ;;  %v1068_v12 = vmul.f32 %v2684_v3, %v2684_v3 }
 0x1f6   : > { %v986_v45 = vadd.f32 %v2182_v1, %v985_v41  ;;  %v1113_v33 = vadd.f32 %v1112_v17, %v1050_v35  ;;  %v2686_v1 = vld [vmem:[#allocation20_spill] sm:$0xff]  ;;  %v1069_v17 = vmul.f32 %v2685_v7, %v2685_v7 }
 0x1f8   : > { %v987_v51 = vadd.f32 %v2198_v5, %v986_v45  ;;  %v1114_v22 = vadd.f32 %v1113_v33, %v1051_v44  ;;  %v2687_v5 = vld [vmem:[#allocation17_spill] sm:$0xff] }
 0x1fa   : > { %v988_v55 = vadd.f32 %v987_v51, %v2222_v11  ;;  %v1115_v60 = vadd.f32 %v1114_v22, %v1052_v18  ;;  %v2688_v11 = vld [vmem:[#allocation19_spill] sm:$0xff]  ;;  %v1070_v18 = vmul.f32 %v2686_v1, %v2686_v1 }
 0x1fc   : > { %v989_v49 = vadd.f32 %v988_v55, %v2238_v15  ;;  %v1116_v29 = vadd.f32 %v1115_v60, %v1053_v50  ;;  %v2689_v15 = vld [vmem:[#allocation22_spill] sm:$0xff]  ;;  %v1071_v50 = vmul.f32 %v2687_v5, %v2687_v5 }
 0x1fe   : > { %v990_v53 = vadd.f32 %v2214_v9, %v989_v49  ;;  %v1117_v20 = vadd.f32 %v1116_v29, %v1054_v37  ;;  %v2690_v9 = vld [vmem:[#allocation24_spill] sm:$0xff]  ;;  %v1072_v37 = vmul.f32 %v2688_v11, %v2688_v11 }
 0x200   : > { %v991_v59 = vadd.f32 %v2230_v13, %v990_v53  ;;  %v1118_v25 = vadd.f32 %v1117_v20, %v1055_v16  ;;  %v2691_v13 = vld [vmem:[#allocation21_spill] sm:$0xff]  ;;  %v1073_v16 = vmul.f32 %v2689_v15, %v2689_v15 }
 0x202   : > { %v992_v63 = vadd.f32 %v991_v59, %v2254_v19  ;;  %v1119_v31 = vadd.f32 %v1118_v25, %v1056_v54  ;;  %v2692_v19 = vld [vmem:[#allocation23_spill] sm:$0xff]  ;;  %v1074_v54 = vmul.f32 %v2690_v9, %v2690_v9  ;;  %v940_v59 = vld [vmem:[#allocation8] sm:$0x1]  ;;  %v1075_v25 = vmul.f32 %v2691_v13, %v2691_v13 }
 0x204   : > { %v993_v57 = vadd.f32 %v992_v63, %v2270_v23  ;;  %v1120_v30 = vadd.f32 %v1119_v31, %v1057_v2  ;;  %v1076_v31 = vmul.f32 %v2692_v19, %v2692_v19 }
 0x206   : > { %v994_v48 = vadd.f32 %v2683_v61, %v993_v57  ;;  %v1121_v24 = vadd.f32 %v1120_v30, %v1058_v26 }
 0x208   : > { %v995_v0 = vadd.f32 %v2684_v3, %v994_v48  ;;  %v1122_v28 = vadd.f32 %v1121_v24, %v1059_v6 }
 0x20a   : > { %v996_v42 = vadd.f32 %v995_v0, %v2685_v7  ;;  %v1123_v34 = vadd.f32 %v1122_v28, %v1060_v27 }
 0x20c   : > { %v997_v58 = vadd.f32 %v996_v42, %v2686_v1  ;;  %v1124_v38 = vadd.f32 %v1123_v34, %v1061_v52 }
 0x20e   : > { %v998_v10 = vadd.f32 %v2687_v5, %v997_v58  ;;  %v1125_v32 = vadd.f32 %v1124_v38, %v1062_v4 }
 0x210   : > { %v999_v39 = vadd.f32 %v2688_v11, %v998_v10  ;;  %v1126_v36 = vadd.f32 %v1125_v32, %v1063_v56 }
 0x212   : > { %v1000_v46 = vadd.f32 %v999_v39, %v2689_v15  ;;  %v1127_v43 = vadd.f32 %v1126_v36, %v1064_v62 }
 0x214   : > { %v1001_v8 = vadd.f32 %v1000_v46, %v2690_v9  ;;  %v1128_v47 = vadd.f32 %v1127_v43, %v1065_v14 }
 0x216   : > { %v1002_v35 = vadd.f32 %v2691_v13, %v1001_v8  ;;  %v1129_v41 = vadd.f32 %v1128_v47, %v1066_v21 }
 0x218   : > { %v1003_v44 = vadd.f32 %v2692_v19, %v1002_v35  ;;  %v1130_v45 = vadd.f32 %v1129_v41, %v1067_v40 }
 0x21a   : > { %v1004_v23 = vrot.slane %v1003_v44, 4  ;;  %v1131_v33 = vadd.f32 %v1130_v45, %v1068_v12 }
 0x21c   : > { %v1005_v51 = vadd.f32 %v1004_v23, %v1003_v44  ;;  %v1132_v22 = vadd.f32 %v1131_v33, %v1069_v17 }
 0x21e   : > { %v1006_v55 = vrot.slane %v1005_v51, 2  ;;  %v1133_v60 = vadd.f32 %v1132_v22, %v1070_v18 }
 0x220   : > { %v1007_v49 = vadd.f32 %v1006_v55, %v1005_v51  ;;  %v1134_v29 = vadd.f32 %v1133_v60, %v1071_v50 }
 0x222   : > { %v1008_v53 = vrot.slane %v1007_v49, 1  ;;  %v1135_v20 = vadd.f32 %v1134_v29, %v1072_v37 }
 0x224   : > { %v1009_v2 = vadd.f32 %v1008_v53, %v1007_v49  ;;  %v1136_v63 = vadd.f32 %v1135_v20, %v1073_v16 }
 0x226   : > { %v1010_v26 = vadd.f32 %v1009_v2, %v940_v59  ;;  %v1137_v57 = vadd.f32 %v1136_v63, %v1074_v54 }
 0x228   : > { %1011 = vst [vmem:[#allocation8] sm:$0x1] %v1010_v26  ;;  %v1138_v6 = vadd.f32 %v1137_v57, %v1075_v25 }
 0x229   : > { %1740 = shalt.err (!%p1737_p3)
}
 0x22a   : > { %s1741_s11 = scalar_lea.hbm %s2631_s3, 16 }
 0x22b   : > { %p1742_p7 = scmp.ne.s32.totalorder %s2631_s3, %s1741_s11  ;;  %p1747_p6 = scmp.lt.u32.totalorder %s1741_s11, %s2631_s3 }
 0x22d   : > { %p1743_p13 = pnand %p1742_p7, %p2693_p10 }
 0x22f   : > { %p1744_p4 = pneg %p1743_p13 }
 0x231   : > { %p1749_p8 = pnand %p1747_p6, %p1744_p4 }
 0x233   : > { %1752 = shalt.err (!%p1749_p8)
}
 0x234   : > { %1517 = dma.vmem_to_hbm [thread:$0]  (%p2693_p10), %s1180_s7, 16, %s2631_s3, [#allocation9]   ;;  %v1139_v30 = vadd.f32 %v1138_v6, %v1076_v31  ;;  %v1012_v0 = vld [vmem:[#allocation10] sm:$0x1] }
 0x235   : > { %s1852_s25 = smov [#allocation10]  }
 0x236   : > { %v1140_v61 = vrot.slane %v1139_v30, 4  ;;  %s1192_s27 = sshll.u32 %s1852_s25, 4  ;;  %s1193_s27 = int_to_ptr.vmem [resolvable:$true] %s1192_s27 }
 0x237   : > { %s1753_s14 = scalar_lea.vmem %s1193_s27, 16  ;;  %s1759_s21 = scalar_lea.vmem %s1193_s27, 32 }
 0x238   : > { %v1141_v48 = vadd.f32 %v1140_v61, %v1139_v30  ;;  %p1754_p12 = scmp.ne.s32.totalorder %s1193_s27, %s1753_s14  ;;  %p1760_p5 = scmp.lt.s32.totalorder %s1193_s27, %s1193_s27 }
 0x239   : > { %p1761_p9 = scmp.lt.s32.totalorder %s1759_s21, %s1753_s14 }
 0x23a   : > { %v1142_v27 = vrot.slane %v1141_v48, 2  ;;  %p1755_p11 = pnand %p1754_p12, %p2693_p10 }
 0x23b   : > { %p1762_p1 = por %p1761_p9, %p1760_p5 }
 0x23c   : > { %v1143_v24 = vadd.f32 %v1142_v27, %v1141_v48  ;;  %p1756_p0 = pneg %p1755_p11 }
 0x23e   : > { %v1144_v3 = vrot.slane %v1143_v24, 1  ;;  %p1763_p2 = pnand %p1762_p1, %p1756_p0 }
 0x240   : > { %v1145_v52 = vadd.f32 %v1144_v3, %v1143_v24 }
 0x242   : > { %v1146_v28 = vadd.f32 %v1145_v52, %v1012_v0 }
 0x244   : > { %1147 = vst [vmem:[#allocation10] sm:$0x1] %v1146_v28 }
 0x245   : > { %1766 = shalt.err (!%p1763_p2)
}
 0x246   : > { %s1767_s22 = scalar_lea.hbm %s2632_s4, 16 }
 0x247   : > { %p1768_p3 = scmp.ne.s32.totalorder %s2632_s4, %s1767_s22  ;;  %p1773_p4 = scmp.lt.u32.totalorder %s1767_s22, %s2632_s4 }
 0x249   : > { %p1769_p7 = pnand %p1768_p3, %p2693_p10 }
 0x24b   : > { %p1770_p13 = pneg %p1769_p7 }
 0x24d   : > { %p1775_p6 = pnand %p1773_p4, %p1770_p13 }
 0x24f   : > { %1778 = shalt.err (!%p1775_p6)
}
 0x250   : > { %1519 = dma.vmem_to_hbm [thread:$0]  (%p2693_p10), %s1193_s27, 16, %s2632_s4, [#allocation9]  }
 0x251   : > { %1812 = dma.done.wait (%p2693_p10), [#allocation9], 32  }
 0x252   : > { %1814 = vsyncadd (%p2693_p10), [#allocation9], 4294967264 }
 0x253 PF: > { %p1544_p8 = scmp.ge.s32.totalorder %s1841_s20, 2  ;;  %s1212_s28 = sand.u32 1, %s1821_s15  }
 0x254   : > { %p2694_p12 = scmp.ne.s32.totalorder %s2662_s26, 0  ;;  %s1213_s29 = scalar_lea.sflag [#allocation4], %s1212_s28 }
 0x256   : > { %p1534_p11 = pnand %p1544_p8, %p2694_p12 }
 0x258   : > { %1816 = dma.done.wait (!%p1534_p11), %s1213_s29, 8192  }
 0x259   : > { %1818 = vsyncadd (!%p1534_p11), %s1213_s29, 4294959104  ;;  %s23_s20 = sadd.s32 1, %s1841_s20   ;;  %s2695_s15 = smov %s1825_s16 }
 0x25a   : > { %p20_p0 = scmp.ge.s32.totalorder %s23_s20, 18   ;;  %s2696_s16 = smov %s1829_s17 }
 0x25b   : > { %s2697_s17 = smov %s1985_s10  ;;  %s2698_s18 = smov %s1837_s19 }
 0x25c   : > { %s2699_s19 = smov %s2701_s5  ;;  %22 = sbr.rel (!%p20_p0) target bundleno = 8 (0x8), region = 100 }
 0x263   :  { %1218 = vsyncpa [#allocation3], 1 }
 0x264   :  { %1220 = vsyncpa [#allocation3 + $0x1], 1 }
 0x265   :  { %1221 = vsyncpa [#allocation6], 1 }
 0x266   :  { %1222 = vsyncpa [#allocation4], 1 }
 0x267   :  { %1224 = vsyncpa [#allocation4 + $0x1], 1 }
 0x268   :  { %1225 = vsyncpa [#allocation9], 1 }

</bundles_post_ra>
